<compile_context>
chip_gen: v7x
topology: tpu7x:2x2x1
jax: 0.10.0
libtpu: 0.0.40
codegen_flags: <defaults>
</compile_context>

<pallas_src>
import numpy as np
import jax
import jax.numpy as jnp
from jax.experimental import pallas as pl
from jax.experimental.pallas import tpu as pltpu


def _interp_matrix(sz: int, s: int) -> jnp.ndarray:
    """(sz, s) bilinear (1-D linear) interpolation matrix, align_corners=True."""
    if s == 1:
        return jnp.ones((sz, 1), jnp.float32)
    src = jnp.arange(sz, dtype=jnp.float32) * (s - 1) / (sz - 1)
    i0 = jnp.floor(src).astype(jnp.int32)
    i1 = jnp.minimum(i0 + 1, s - 1)
    fr = src - i0.astype(jnp.float32)
    eye = jnp.eye(s, dtype=jnp.float32)
    w = eye[i0] * (1.0 - fr)[:, None] + eye[i1] * fr[:, None]
    return w.astype(jnp.float32)


def _step_vmem_bytes(c_blk: int, s_pad: int, sz: int) -> int:
    """Per-grid-step VMEM footprint (f32):
       2x input block + 2x output block (double-buffered)
       + 2x W + 2x W^T (double-buffered, constant index_map)
       + stage-1 intermediate (c*s_pad*sz) + broadcast W (c*sz*s_pad)
       + one output slab of staging for the batched matmul result."""
    return 4 * (c_blk * (2 * s_pad * s_pad + 3 * sz * sz + 2 * s_pad * sz)
                + 4 * s_pad * sz)


def _vmem_budget_and_limit():
    """Generation-aware (block-sizing budget, vmem_limit_bytes)."""
    cap = 64 * 1024 * 1024                       # conservative default (v7x-like)
    try:
        cap = int(pltpu.get_tpu_info().vmem_capacity_bytes)
    except Exception:
        pass
    if cap >= 100 * 1024 * 1024:                 # v5e / v6e: 128 MiB physical VMEM
        return 56 * 1024 * 1024, 96 * 1024 * 1024
    return 32 * 1024 * 1024, 48 * 1024 * 1024    # v7x: 64 MiB per TensorCore


def _choose_channel_block(b: int, n_ch: int, s_pad: int, sz: int,
                          budget_bytes: int) -> int:
    """Channel-block size: as large as the VMEM budget allows, then adjusted so
    the (parallel) grid load-balances across 2 TensorCores (v7x)."""
    max_c = 1
    for c in range(1, n_ch + 1):
        if _step_vmem_bytes(c, s_pad, sz) <= budget_bytes:
            max_c = c
    best_key, best_c = None, max_c
    for c in range(1, max_c + 1):
        steps = -(-n_ch // c)                    # cdiv: partial last block allowed
        total = b * steps                        # total parallel grid points
        busier = -(-total // 2)                  # steps on the busier TensorCore
        work = busier * c                        # ~channels handled by busier core
        key = (work, total)                      # tie-break: fewer steps (overhead)
        if best_key is None or key < best_key:
            best_key, best_c = key, c
    return best_c


def _tile_interp_kernel(x_ref, w_ref, wt_ref, o_ref):
    # x_ref : (1, C_blk, s_pad, s_pad)  zero-padded sub-sampled measurements
    # w_ref : (sz, s_pad)               interpolation matrix W (padded cols = 0)
    # wt_ref: (s_pad, sz)               precomputed W^T (lane-dense)
    # o_ref : (1, C_blk, sz, sz)        upsampled output channels
    c_blk, s_pad = x_ref.shape[1], x_ref.shape[2]
    sz = o_ref.shape[2]
    w = w_ref[...]                                        # (sz, s_pad)
    wt = wt_ref[...]                                      # (s_pad, sz)

    # Stage 1: one fused lane-dense matmul across the channel block.
    # s_pad % 8 == 0 -> the reshapes are layout-preserving (no relayout copy).
    x2 = x_ref[0].reshape(c_blk * s_pad, s_pad)
    tmp = jnp.dot(x2, wt, preferred_element_type=jnp.float32)   # (C*s_pad, sz)
    tmp3 = tmp.reshape(c_blk, s_pad, sz)

    # Stage 2: single batched matmul (W broadcast on the channel dim) so the
    # result lands directly in (C_blk, sz, sz) order — lane-dense store, no
    # per-channel unroll, no output transpose.  Broadcast hoisted (once/step).
    w_b = jnp.broadcast_to(w, (c_blk, sz, s_pad))
    out = jax.lax.dot_general(
        w_b, tmp3,
        dimension_numbers=(((2,), (1,)), ((0,), (0,))),
        preferred_element_type=jnp.float32)               # (C_blk, sz, sz)
    o_ref[0] = out.astype(o_ref.dtype)


def tile_interp(coded: jnp.ndarray, tile_size: int, sz: int) -> jnp.ndarray:
    """Pallas equivalent of TileInterp.forward (interp='bilinear', align_corners=True)."""
    b = coded.shape[0]
    T = tile_size
    assert sz % T == 0, "sz must be divisible by tile_size"
    s = sz // T
    n_ch = T * T
    s_pad = ((s + 7) // 8) * 8

    # Glue (layout plumbing, once in JAX): extract the T*T stride-T grids with
    # channel order c = i*T + j, and zero-pad the small spatial dims to a
    # multiple of 8 so all in-kernel reshapes are layout-preserving.
    x = coded[:, 0].astype(jnp.float32)                  # (b, sz, sz)
    x = x.reshape(b, s, T, s, T)
    x = x.transpose(0, 2, 4, 1, 3)                       # (b, T, T, s, s)
    sampled = x.reshape(b, n_ch, s, s)                   # (b, T*T, s, s)
    if s_pad != s:
        sampled = jnp.pad(sampled,
                          ((0, 0), (0, 0), (0, s_pad - s), (0, s_pad - s)))

    w = _interp_matrix(sz, s)                            # (sz, s)
    if s_pad != s:
        w = jnp.pad(w, ((0, 0), (0, s_pad - s)))         # zero cols: padded K -> 0
    wt = jnp.transpose(w)                                # (s_pad, sz), trace-time

    budget, vmem_limit = _vmem_budget_and_limit()
    c_blk = _choose_channel_block(b, n_ch, s_pad, sz, budget)
    # Never set a limit below what one step actually needs (+ headroom).
    vmem_limit = max(vmem_limit, _step_vmem_bytes(c_blk, s_pad, sz) + (8 << 20))
    n_cblocks = -(-n_ch // c_blk)                        # cdiv: partial last block OK
    grid = (b, n_cblocks)

    out = pl.pallas_call(
        _tile_interp_kernel,
        out_shape=jax.ShapeDtypeStruct((b, n_ch, sz, sz), jnp.float32),
        grid_spec=pltpu.PrefetchScalarGridSpec(
            num_scalar_prefetch=0,
            grid=grid,
            in_specs=[
                pl.BlockSpec((1, c_blk, s_pad, s_pad),
                             lambda bi, ci: (bi, ci, 0, 0)),
                # W / W^T: constant index_map -> DMA'd once; their (small)
                # double-buffer footprint is counted in _step_vmem_bytes.
                pl.BlockSpec((sz, s_pad), lambda bi, ci: (0, 0)),
                pl.BlockSpec((s_pad, sz), lambda bi, ci: (0, 0)),
            ],
            out_specs=pl.BlockSpec((1, c_blk, sz, sz),
                                   lambda bi, ci: (bi, ci, 0, 0)),
        ),
        compiler_params=pltpu.CompilerParams(
            dimension_semantics=("parallel", "parallel"),
            vmem_limit_bytes=vmem_limit),
    )(sampled, w, wt)
    return out


def _reference_tile_interp(coded, tile_size, sz):
    """Pure numpy reference matching F.interpolate(bilinear, align_corners=True)."""
    coded = np.asarray(coded, np.float32)
    b = coded.shape[0]
    s = sz // tile_size
    out = np.zeros((b, tile_size ** 2, sz, sz), np.float32)
    if s == 1:
        src = np.zeros(sz)
    else:
        src = np.arange(sz) * (s - 1) / (sz - 1)
    i0 = np.floor(src).astype(np.int64)
    i1 = np.minimum(i0 + 1, s - 1)
    fr = (src - i0).astype(np.float32)
    c = 0
    for i in range(tile_size):
        for j in range(tile_size):
            m = coded[:, 0, i::tile_size, j::tile_size]                     # (b, s, s)
            rows = (m[:, i0, :] * (1.0 - fr)[None, :, None]
                    + m[:, i1, :] * fr[None, :, None])                      # (b, sz, s)
            full = (rows[:, :, i0] * (1.0 - fr)[None, None, :]
                    + rows[:, :, i1] * fr[None, None, :])                   # (b, sz, sz)
            out[:, c] = full
            c += 1
    return out


if __name__ == "__main__":
    # Small deterministic example: batch=2, single coded channel, sz=16, tile_size=2.
    key = jax.random.PRNGKey(0)
    b, sz, tile_size = 2, 16, 2
    coded = jax.random.normal(key, (b, 1, sz, sz), dtype=jnp.float32)

    out = tile_interp(coded, tile_size, sz)
    out = jax.block_until_ready(out)

    ref = _reference_tile_interp(coded, tile_size, sz)
    assert out.shape == (b, tile_size ** 2, sz, sz)
    np.testing.assert_allclose(np.asarray(out), ref, rtol=1e-5, atol=1e-5)

    print("KERNEL_OK")
</pallas_src>

<mosaic_0001>
module attributes {stable_mosaic.version = 11 : i64} {
  func.func @_tile_interp_kernel(%arg0: i32, %arg1: i32, %arg2: memref<1x4x8x8xf32, #tpu.memory_space<vmem>>, %arg3: memref<16x8xf32, #tpu.memory_space<vmem>>, %arg4: memref<8x16xf32, #tpu.memory_space<vmem>>, %arg5: memref<1x4x16x16xf32, #tpu.memory_space<vmem>>) attributes {dimension_semantics = [#tpu.dimension_semantics<parallel>, #tpu.dimension_semantics<parallel>], iteration_bounds = array<i64: 2, 1>, scalar_prefetch = 0 : i64, scratch_operands = 0 : i64, tpu.core_type = #tpu.core_type<tc>, window_params = [{transform_indices = @transform_0, window_bounds = array<i64: 1, 4, 8, 8>}, {pipeline_mode = #tpu.pipeline_mode<synchronous>, transform_indices = @transform_1, window_bounds = array<i64: 16, 8>}, {pipeline_mode = #tpu.pipeline_mode<synchronous>, transform_indices = @transform_2, window_bounds = array<i64: 8, 16>}, {transform_indices = @transform_3, window_bounds = array<i64: 1, 4, 16, 16>}]} {
    %c0 = arith.constant 0 : index
    %c0_0 = arith.constant 0 : index
    %0 = vector.load %arg3[%c0, %c0_0] : memref<16x8xf32, #tpu.memory_space<vmem>>, vector<16x8xf32>
    %c0_1 = arith.constant 0 : index
    %c0_2 = arith.constant 0 : index
    %1 = vector.load %arg4[%c0_1, %c0_2] : memref<8x16xf32, #tpu.memory_space<vmem>>, vector<8x16xf32>
    %c0_3 = arith.constant 0 : index
    %c0_4 = arith.constant 0 : index
    %c0_5 = arith.constant 0 : index
    %c0_6 = arith.constant 0 : index
    %2 = vector.load %arg2[%c0_3, %c0_4, %c0_5, %c0_6] : memref<1x4x8x8xf32, #tpu.memory_space<vmem>>, vector<1x4x8x8xf32>
    %3 = vector.shape_cast %2 : vector<1x4x8x8xf32> to vector<4x8x8xf32>
    %4 = vector.shape_cast %3 : vector<4x8x8xf32> to vector<32x8xf32>
    %cst = arith.constant dense<0.000000e+00> : vector<32x16xf32>
    %5 = tpu.matmul %4, %1, %cst {dimension_numbers = #tpu.dot_dimension_numbers<[1], [0], [0], [1], [0, 0, 1, 1], [], []>} : vector<32x8xf32>, vector<8x16xf32>, vector<32x16xf32> -> vector<32x16xf32>
    %6 = vector.shape_cast %5 : vector<32x16xf32> to vector<4x8x16xf32>
    %7 = vector.shape_cast %0 : vector<16x8xf32> to vector<1x16x8xf32>
    %8 = vector.broadcast %7 : vector<1x16x8xf32> to vector<4x16x8xf32>
    %cst_7 = arith.constant dense<0.000000e+00> : vector<4x16x16xf32>
    %9 = tpu.matmul %8, %6, %cst_7 {dimension_numbers = #tpu.dot_dimension_numbers<[2], [1], [1], [2], [0, 0, 0, 1, 1, 2], [0], [0]>} : vector<4x16x8xf32>, vector<4x8x16xf32>, vector<4x16x16xf32> -> vector<4x16x16xf32>
    %c0_8 = arith.constant 0 : index
    %c0_9 = arith.constant 0 : index
    %c0_10 = arith.constant 0 : index
    %c0_11 = arith.constant 0 : index
    %10 = vector.load %arg5[%c0_8, %c0_9, %c0_10, %c0_11] : memref<1x4x16x16xf32, #tpu.memory_space<vmem>>, vector<1x4x16x16xf32>
    %11 = vector.shape_cast %10 : vector<1x4x16x16xf32> to vector<4x16x16xf32>
    %12 = vector.shape_cast %9 : vector<4x16x16xf32> to vector<1x4x16x16xf32>
    tpu.vector_store %arg5[%c0_8, %c0_9, %c0_10, %c0_11], %12 {strides = array<i32>} : memref<1x4x16x16xf32, #tpu.memory_space<vmem>>, vector<1x4x16x16xf32>,
    return
  }
  func.func @transform_0(%arg0: i32, %arg1: i32) -> (i32, i32, i32, i32) {
    %c0_i32 = arith.constant 0 : i32
    %c0_i32_0 = arith.constant 0 : i32
    %c0_i32_1 = arith.constant 0 : i32
    return %arg0, %arg1, %c0_i32, %c0_i32_0 : i32, i32, i32, i32
  }
  func.func @transform_1(%arg0: i32, %arg1: i32) -> (i32, i32) {
    %c0_i32 = arith.constant 0 : i32
    %c0_i32_0 = arith.constant 0 : i32
    %c0_i32_1 = arith.constant 0 : i32
    return %c0_i32, %c0_i32_0 : i32, i32
  }
  func.func @transform_2(%arg0: i32, %arg1: i32) -> (i32, i32) {
    %c0_i32 = arith.constant 0 : i32
    %c0_i32_0 = arith.constant 0 : i32
    %c0_i32_1 = arith.constant 0 : i32
    return %c0_i32, %c0_i32_0 : i32, i32
  }
  func.func @transform_3(%arg0: i32, %arg1: i32) -> (i32, i32, i32, i32) {
    %c0_i32 = arith.constant 0 : i32
    %c0_i32_0 = arith.constant 0 : i32
    %c0_i32_1 = arith.constant 0 : i32
    return %arg0, %arg1, %c0_i32, %c0_i32_0 : i32, i32, i32, i32
  }
}

</mosaic_0001>

<bundles_post_ra>
// kernel: tpu_custom_call.1
= control target key start
LH: loop header
LB: loop body
LE: loop exit
PB: predicated region body
PF: predicated region fallthrough
CT: control target
= control target key end

     0   :  { %8 = vsyncpa [#allocation3], 0  ;;  %s1218_s0 = inlined_call_operand.hbm [shape: f32[2,4,8,8], index: 0, kind: input, shape index: {}]   ;;  %s1219_s1 = inlined_call_operand.vmem [shape: f32[16,8], index: 1, kind: input, shape index: {}]   ;;  %s1220_s2 = inlined_call_operand.vmem [shape: f32[8,16], index: 2, kind: input, shape index: {}]   ;;  %s1221_s3 = inlined_call_operand.hbm [shape: f32[2,4,16,16], index: 3, kind: output, shape index: {}]  }
   0x1   :  { %10 = vsyncpa [#allocation3 + $0x1], 0 }
   0x2   :  { %11 = vsyncpa [#allocation4], 0 }
   0x3   :  { %13 = vsyncpa [#allocation4 + $0x1], 0  ;;  %s1013_s12 = smov 0   ;;  %s1015_s13 = smov 0  }
   0x4   :  { %s1017_s14 = smov 0   ;;  %s1019_s15 = smov 0  }
   0x5   :  { %s1021_s16 = smov 0   ;;  %s1023_s17 = smov 0  }
   0x6 LB: > { %s733_s18 = sadd.s32 4294967295, %s985_s17   ;;  %s734_s19 = sadd.s32 4294967294, %s985_s17   ;;  %s985_s17 = sphi %s1023_s17, %s19_s17   ;;  %s981_s16 = sphi %s1021_s16, %s1236_s16   ;;  %s977_s15 = sphi %s1019_s15, %s1235_s15   ;;  %s973_s14 = sphi %s1017_s14, %s1234_s14   ;;  %s969_s13 = sphi %s1015_s13, %s1233_s13   ;;  %s965_s12 = sphi %s1013_s12, %s1232_s12  }
   0x7   : > { %s31_s20 = sadd.s32 1, %s981_s16  ;;  %s40_s21 = sadd.s32 1, %s973_s14 }
   0x8   : > { %p33_p0 = scmp.ge.s32.totalorder %s31_s20, 2  ;;  %p47_p1 = scmp.ne.s32.totalorder %s973_s14, %s969_s13 }
   0x9   : > { %p48_p2 = scmp.eq.s32.totalorder %s985_s17, 0  ;;  %p53_p3 = scmp.ne.s32.totalorder %s969_s13, %s965_s12 }
   0xa   : > { %s1238_s20 = smov (%p33_p0, %s31_s20), 0  ;;  %p54_p5 = scmp.eq.s32.totalorder %s733_s18, 0 }
   0xb   : > { %p1054_p4 = por %p48_p2, %p47_p1  ;;  %s35_s23 = ssub.s32 %s981_s16, %s1238_s20 }
   0xc   : > { %p121_p6 = scmp.eq.s32.totalorder %s733_s18, 1  ;;  %p38_p7 = scmp.eq.s32.totalorder %s35_s23, 0 }
   0xd   : > { %p1060_p8 = por %p54_p5, %p53_p3  ;;  %p127_p10 = scmp.eq.s32.totalorder %s734_s19, 1 }
   0xe   : > { %p1064_p9 = por %p121_p6, %p47_p1  ;;  %p819_p13 = scmp.lt.s32.totalorder %s985_s17, 2 }
   0xf   : > { %s1069_s26 = scalar_select %p38_p7, %s973_s14, %s40_s21  }
  0x10   : > { %s1225_s25 = scalar_select %p1064_p9, 1, 0 }
  0x11   : > { %p1071_p11 = por %p127_p10, %p53_p3  ;;  %s153_s28 = sand.u32 1, %s973_s14  }
  0x12   : > { %s737_s29 = sshll.u32 %s153_s28, 5  ;;  %s760_s30 = sshll.u32 %s981_s16, 9 }
  0x13   : > { %s1226_s27 = scalar_select %p1071_p11, 1, 0 }
  0x14   : > { %s1082_s6 = scalar_lea.hbm %s1218_s0, %s760_s30  ;;  %s157_s7 = scalar_lea.vmem [#allocation2], %s737_s29 }
  0x15   : > { %s166_s8 = sshll.u32 %s157_s7, 4  ;;  %p1088_p0 = pnand %p819_p13, %p1054_p4  ;;  %s1084_s8 = int_to_ptr.vmem [resolvable:$true] %s166_s8 }
  0x16   : > { %s1093_s10 = scalar_lea.sflag [#allocation3], %s153_s28  ;;  %s873_s11 = scalar_lea.hbm %s1082_s6, 512 }
  0x17   : > { %p874_p2 = scmp.ne.s32.totalorder %s1082_s6, %s873_s11  ;;  %p875_p3 = pneg %p1088_p0 }
  0x18   : > { %s878_s21 = scalar_lea.hbm %s1218_s0, 1024  ;;  %p879_p4 = scmp.lt.u32.totalorder %s1082_s6, %s1218_s0 }
  0x19   : > { %p876_p5 = pnand %p875_p3, %p874_p2  ;;  %p880_p7 = scmp.lt.u32.totalorder %s878_s21, %s873_s11 }
  0x1a   : > { %p882_p13 = scmp.lt.u32.totalorder %s873_s11, %s1082_s6 }
  0x1b   : > { %p877_p6 = pneg %p876_p5  ;;  %p881_p10 = por %p880_p7, %p879_p4 }
  0x1d   : > { %p883_p12 = por %p882_p13, %p881_p10 }
  0x1f   : > { %p884_p1 = pnand %p883_p12, %p877_p6 }
  0x21   : > { %887 = shalt.err (!%p884_p1)
}
  0x22   : > { %s888_s28 = scalar_lea.vmem %s1084_s8, 512  ;;  %s987_s29 = smov [#allocation2]  }
  0x23   : > { %p889_p2 = scmp.ne.s32.totalorder %s1084_s8, %s888_s28  ;;  %s893_s30 = sshll.u32 %s987_s29, 4  ;;  %s894_s30 = int_to_ptr.vmem [resolvable:$false] %s893_s30 }
  0x24   : > { %s895_s4 = scalar_lea.vmem %s894_s30, 1024  ;;  %p896_p9 = scmp.lt.s32.totalorder %s1084_s8, %s894_s30 }
  0x25   : > { %p891_p5 = pnand %p889_p2, %p875_p3  ;;  %p897_p4 = scmp.lt.s32.totalorder %s895_s4, %s888_s28 }
  0x27   : > { %p892_p11 = pneg %p891_p5  ;;  %p898_p7 = por %p897_p4, %p896_p9 }
  0x29   : > { %p899_p10 = pnand %p898_p7, %p892_p11 }
  0x2b   : > { %902 = shalt.err (!%p899_p10)
}
  0x2c   : > { %s988_s5 = smov 128   ;;  %s989_s7 = smov 8  }
  0x2d   : > { %814 = dma.hbm_to_vmem [thread:$0]  (!%p1088_p0), %s1082_s6, 512, %s1084_s8, %s1093_s10, %s988_s5, %s988_s5, %s989_s7  }
  0x2e   : > { %p174_p12 = scmp.lt.s32.totalorder %s985_s17, 3  ;;  %p1228_p1 = scmp.ge.s32.totalorder %s985_s17, 1 }
  0x30   : > { %p175_p3 = pnand %p1228_p1, %p174_p12 }
  0x31   : > { %s1125_s11 = sand.u32 (!%p175_p3), 1, %s969_s13  }
  0x32   : > { %178 = sbr.rel (%p175_p3) target bundleno = 512 (0x200), region = 32  ;;  %s741_s18 = sshll.u32 (!%p175_p3), %s1125_s11, 5 }
  0x33   : > { %s181_s19 = scalar_lea.sflag (!%p175_p3), [#allocation3], %s1125_s11  ;;  %s184_s21 = scalar_lea.vmem (!%p175_p3), [#allocation2], %s741_s18 }
  0x39   : > { %956 = dma.done.wait (%p1060_p8), %s181_s19, 512  }
  0x3a   : > { %958 = vsyncadd (%p1060_p8), %s181_s19, 4294966784  ;;  %vm216_vm0 = vcmask 64512   ;;  %v211_v0 = vld [vmem:[%s1220_s2] sm:$0xff]  ;;  %v213_v2 = vld [vmem:[%s184_s21 + $0x8] sm:$0xff]  ;;  %s742_s23 = sshll.u32 %s1125_s11, 6  ;;  %vm620_vm1 = vcmask 130048  }
  0x3b   : > { %v212_v1 = vld [vmem:[%s184_s21] sm:$0xff]  ;;  %779 = vmatprep.subr.mxu0 %v211_v0  ;;  %v214_v3 = vld [vmem:[%s184_s21 + $0x10] sm:$0xff]  ;;  %v215_v4 = vld [vmem:[%s184_s21 + $0x18] sm:$0xff]  ;;  %s206_s28 = scalar_lea.vmem [#allocation5], %s742_s23  ;;  %s761_s30 = sshll.u32 %s977_s15, 10 }
  0x3c   : > { %781 = vmatprep.mubr.msk.f32.mxu0 %vm216_vm0, %v212_v1  ;;  %780 = vmatpush3.msra.mxu0 %v211_v0  ;;  %v209_v5 = vld [vmem:[%s1219_s1] sm:$0xff]  ;;  %v210_v8 = vld [vmem:[%s1219_s1 + $0x8] sm:$0xff]  ;;  %s646_s29 = sshll.u32 %s206_s28, 4  ;;  %s1167_s15 = scalar_lea.hbm %s1221_s3, %s761_s30  ;;  %s1160_s29 = int_to_ptr.vmem [resolvable:$true] %s646_s29 }
  0x3d   : > { %782 = vmatmul.mubr.msk.f32.vlgmr.msra.gmra.mrb[0].mxu0 %vm216_vm0, %v213_v2  ;;  %789 = vmatprep.mubr.msk.f32.mxu1 %vm216_vm0, %v209_v5  ;;  %s630_s7 = scalar_lea.sflag [#allocation4], %s1125_s11  ;;  %s903_s18 = scalar_lea.vmem %s1160_s29, 1024 }
  0x3e   : > { %784 = vmatprep.mubr.msk.f32.mxu0 %vm216_vm0, %v214_v3  ;;  %p904_p8 = scmp.ne.s32.totalorder %s1160_s29, %s903_s18  ;;  %p1229_p9 = scmp.ne.s32.totalorder %s1225_s25, 0 }
  0x3f   : > { %s990_s19 = smov [#allocation5]  }
  0x40   : > { %p905_p11 = pnand %p904_p8, %p1229_p9  ;;  %s907_s21 = sshll.u32 %s990_s19, 4  ;;  %s908_s21 = int_to_ptr.vmem [resolvable:$false] %s907_s21 }
  0x41   : > { %785 = vmatmul.mubr.msk.f32.gmra.mrb[2].mxu0 %vm216_vm0, %v215_v4  ;;  %s909_s6 = scalar_lea.vmem %s908_s21, 2048  ;;  %p910_p6 = scmp.lt.s32.totalorder %s1160_s29, %s908_s21 }
  0x42   : > { %799 = vmatprep.mubr.msk.f32.mxu0 %vm216_vm0, %v209_v5  ;;  %p906_p0 = pneg %p905_p11  ;;  %p911_p13 = scmp.lt.s32.totalorder %s909_s6, %s903_s18 }
  0x44   : > { %p912_p2 = por %p911_p13, %p910_p6 }
  0x46   : > { %p913_p5 = pnand %p912_p2, %p906_p0 }
 0x110   : > { %v783_v6 = vpop.f32.mrb[0].mxu0 }
 0x111   : > { %v295_v7 = vpop.f32.mrb[1].mxu0 }
 0x112   : > { %787 = vmatprep.subr.mxu1 %v295_v7 }
 0x113   : > { %788 = vmatpush3.msra.mxu1 %v295_v7 }
 0x114   : > { %v786_v9 = vpop.f32.mrb[2].mxu0  ;;  %790 = vmatmul.mubr.msk.f32.vlgmr.msra.gmra.mrb[0].mxu1 %vm216_vm0, %v210_v8  ;;  %792 = vmatprep.subr.mxu1 %v783_v6 }
 0x115   : > { %v305_v10 = vpop.f32.mrb[3].mxu0  ;;  %793 = vmatpush3.msra.mxu1 %v783_v6  ;;  %794 = vmatprep.mubr.msk.f32.mxu1 %vm216_vm0, %v209_v5 }
 0x116   : > { %797 = vmatprep.subr.mxu0 %v305_v10  ;;  %802 = vmatprep.subr.mxu1 %v786_v9 }
 0x117   : > { %798 = vmatpush3.msra.mxu0 %v305_v10 }
 0x118   : > { %795 = vmatmul.mubr.msk.f32.vlgmr.msra.gmra.mrb[2].mxu1 %vm216_vm0, %v210_v8  ;;  %800 = vmatmul.mubr.msk.f32.vlgmr.msra.gmra.mrb[4].mxu0 %vm216_vm0, %v210_v8 }
 0x119   : > { %803 = vmatpush3.msra.mxu1 %v786_v9  ;;  %804 = vmatprep.mubr.msk.f32.mxu1 %vm216_vm0, %v209_v5 }
 0x11c   : > { %805 = vmatmul.mubr.msk.f32.vlgmr.msra.gmra.mrb[4].mxu1 %vm216_vm0, %v210_v8 }
 0x1e7   : > { %v791_v11 = vpop.f32.mrb[0].mxu1 }
 0x1e8   : > { %622 = vst.msk [vmem:[%s206_s28 + $0x8] sm:$0xff] %vm620_vm1, %v791_v11  ;;  %v386_v12 = vpop.f32.mrb[1].mxu1 }
 0x1e9   : > { %621 = vst.msk [vmem:[%s206_s28] sm:$0xff] %vm620_vm1, %v386_v12 }
 0x1eb   : > { %v796_v13 = vpop.f32.mrb[2].mxu1  ;;  %v801_v14 = vpop.f32.mrb[4].mxu0 }
 0x1ec   : > { %624 = vst.msk [vmem:[%s206_s28 + $0x18] sm:$0xff] %vm620_vm1, %v796_v13  ;;  %v461_v15 = vpop.f32.mrb[3].mxu1  ;;  %626 = vst.msk [vmem:[%s206_s28 + $0x28] sm:$0xff] %vm620_vm1, %v801_v14  ;;  %v536_v16 = vpop.f32.mrb[5].mxu0 }
 0x1ed   : > { %623 = vst.msk [vmem:[%s206_s28 + $0x10] sm:$0xff] %vm620_vm1, %v461_v15  ;;  %625 = vst.msk [vmem:[%s206_s28 + $0x20] sm:$0xff] %vm620_vm1, %v536_v16 }
 0x1ef   : > { %v806_v17 = vpop.f32.mrb[4].mxu1 }
 0x1f0   : > { %628 = vst.msk [vmem:[%s206_s28 + $0x38] sm:$0xff] %vm620_vm1, %v806_v17  ;;  %v611_v18 = vpop.f32.mrb[5].mxu1 }
 0x1f1   : > { %627 = vst.msk [vmem:[%s206_s28 + $0x30] sm:$0xff] %vm620_vm1, %v611_v18 }
 0x1f2   : > { %916 = shalt.err (!%p913_p5)
}
 0x1f3   : > { %s917_s8 = scalar_lea.hbm %s1167_s15, 1024  ;;  %s921_s10 = scalar_lea.hbm %s1221_s3, 2048 }
 0x1f4   : > { %p918_p4 = scmp.ne.s32.totalorder %s1167_s15, %s917_s8  ;;  %p922_p12 = scmp.lt.u32.totalorder %s1167_s15, %s1221_s3 }
 0x1f5   : > { %p923_p1 = scmp.lt.u32.totalorder %s921_s10, %s917_s8  ;;  %p925_p8 = scmp.lt.u32.totalorder %s917_s8, %s1167_s15 }
 0x1f6   : > { %p919_p7 = pnand %p918_p4, %p1229_p9 }
 0x1f7   : > { %p924_p3 = por %p923_p1, %p922_p12 }
 0x1f8   : > { %p920_p10 = pneg %p919_p7 }
 0x1f9   : > { %p926_p11 = por %p925_p8, %p924_p3 }
 0x1fb   : > { %p927_p0 = pnand %p926_p11, %p920_p10 }
 0x1fd   : > { %930 = shalt.err (!%p927_p0)
}
 0x1fe   : > { %s991_s28 = smov 128   ;;  %s992_s30 = smov 8  }
 0x1ff   : > { %809 = dma.vmem_to_hbm [thread:$0]  (%p1229_p9), %s1160_s29, 1024, %s1167_s15, %s630_s7, %s991_s28, %s991_s28, %s992_s30  }
 0x200 PF: > { %s661_s4 = sand.u32 1, %s965_s12   ;;  %p1230_p6 = scmp.ne.s32.totalorder %s1226_s27, 0 }
 0x201   : > { %p1231_p13 = scmp.ge.s32.totalorder %s985_s17, 2  ;;  %s662_s5 = scalar_lea.sflag [#allocation4], %s661_s4 }
 0x203   : > { %p816_p2 = pnand %p1231_p13, %p1230_p6 }
 0x205   : > { %960 = dma.done.wait (!%p816_p2), %s662_s5, 1024  }
 0x206   : > { %962 = vsyncadd (!%p816_p2), %s662_s5, 4294966272  ;;  %s19_s17 = sadd.s32 1, %s985_s17   ;;  %s1232_s12 = smov %s969_s13 }
 0x207   : > { %p16_p5 = scmp.ge.s32.totalorder %s19_s17, 4   ;;  %s1233_s13 = smov %s973_s14 }
 0x208   : > { %s1234_s14 = smov %s1069_s26  ;;  %s1235_s15 = smov %s981_s16 }
 0x209   : > { %s1236_s16 = smov %s1238_s20  ;;  %18 = sbr.rel (!%p16_p5) target bundleno = 6 (0x6), region = 77 }
 0x210   :  { %667 = vsyncpa [#allocation3], 1 }
 0x211   :  { %669 = vsyncpa [#allocation3 + $0x1], 1 }
 0x212   :  { %670 = vsyncpa [#allocation4], 1 }
 0x213   :  { %672 = vsyncpa [#allocation4 + $0x1], 1 }

</bundles_post_ra>
